<compile_context>
chip_gen: v7x
topology: tpu7x:2x2x1
jax: 0.10.0
libtpu: 0.0.40
codegen_flags: <defaults>
</compile_context>

<pallas_src>
import math
import jax
import jax.numpy as jnp
from jax.experimental import pallas as pl

# ---- synthetic config (stands in for load_global_config / audio_encoder section) ----
EMBED_DIM = 32          # config['embed_dim']
IN_CHANNELS = 1         # config['in_channels']
PATCH_SIZE = 16         # audio_config['patch_size']
MAX_POS = 64            # config['max_position_embeddings']
AUDIO_LENGTH = 120      # audio_config['audio_length'] ( < L*PATCH_SIZE, exercises final slice)
NUM_STYLES = 4          # transformer.num_styles (style_embeddings kept for parameter parity)
SEQ_LEN = 8
BATCH = 2


def _sinusoidal_pos_embed(max_pos: int, dim: int) -> jnp.ndarray:
    """Mirrors AudioDecoder._init_sinusoidal_encoding (shape (1, max_pos, dim))."""
    position = jnp.arange(max_pos, dtype=jnp.float32)[:, None]
    div_term = jnp.exp(
        jnp.arange(0, dim, 2, dtype=jnp.float32) * (-math.log(10000.0) / dim)
    )
    pe = jnp.zeros((max_pos, dim), jnp.float32)
    pe = pe.at[:, 0::2].set(jnp.sin(position * div_term))
    pe = pe.at[:, 1::2].set(jnp.cos(position * div_term))
    return pe[None]


def make_blockdiag_projection(projection: jnp.ndarray, seq_len: int) -> jnp.ndarray:
    """One-time (load-time) weight preprocessing.

    Builds W_big of shape (L*D, L*PC) with W_big[l*D + d, l*PC + p] = projection[d, p]
    and zeros elsewhere, so that  x.reshape(B, L*D) @ W_big  ==  the per-token
    projection followed by flattening the (L, PC) patches into one 128-lane row.
    """
    D, PC = projection.shape
    eye = jnp.eye(seq_len, dtype=projection.dtype)
    w_big = jnp.einsum("ij,dp->idjp", eye, projection)
    return w_big.reshape(seq_len * D, seq_len * PC)


def audio_decoder_kernel(x_ref, pos_ref, w_ref, out_ref):
    """Single-invocation fused hot path:
         h        = x_flat + pos_flat      (VPU elementwise, pos broadcast over batch)
         waveform = h @ W_blockdiag        (one MXU matmul, N = L*PC = 128 lanes)

       x_ref: (B, L*D)   pos_ref: (1, L*D)   w_ref: (L*D, L*PC)   out_ref: (B, L*PC)
    """
    h = x_ref[...] + pos_ref[...]
    # TODO(synk): the external `Transformer(x, style_id)` submodule is not defined in the
    # provided source, so its internals cannot be reproduced here; identity is used instead.
    out = jnp.dot(h, w_ref[...], preferred_element_type=jnp.float32)
    out_ref[...] = out.astype(out_ref.dtype)


def audio_decoder_forward(x, pos_embed, w_blockdiag, style_id=None):
    """x: (B, L, D) -> waveform (B, C, audio_length)."""
    B, L, D = x.shape
    PC = PATCH_SIZE * IN_CHANNELS
    LD = L * D
    LPC = L * PC

    x_flat = x.reshape(B, LD)                        # wrapper-side layout glue (free in XLA)
    pos_flat = pos_embed[0, :L, :].reshape(1, LD)    # static slice of positional encoding

    cost = pl.CostEstimate(
        flops=2 * B * LD * LPC,
        transcendentals=0,
        bytes_accessed=4 * (B * LD + LD + LD * LPC + B * LPC),
    )

    patches_flat = pl.pallas_call(
        audio_decoder_kernel,
        out_shape=jax.ShapeDtypeStruct((B, LPC), x.dtype),
        # Single grid step (grid=()): whole arrays resident in VMEM, loaded exactly once.
        in_specs=[
            pl.BlockSpec((B, LD), lambda: (0, 0)),
            pl.BlockSpec((1, LD), lambda: (0, 0)),
            pl.BlockSpec((LD, LPC), lambda: (0, 0)),
        ],
        out_specs=pl.BlockSpec((B, LPC), lambda: (0, 0)),
        cost_estimate=cost,
    )(x_flat, pos_flat, w_blockdiag)

    # _patches_to_waveform: for C == 1 the kernel output already IS the waveform
    # layout (lane-dense), so this is a pure metadata reshape + slice.
    if IN_CHANNELS == 1:
        waveform = patches_flat.reshape(B, 1, L * PATCH_SIZE)
    else:
        p = patches_flat.reshape(B, L, IN_CHANNELS, PATCH_SIZE)
        p = jnp.transpose(p, (0, 2, 1, 3))           # (B, C, L, P)
        waveform = p.reshape(B, IN_CHANNELS, L * PATCH_SIZE)
    return waveform[..., :AUDIO_LENGTH]


def _reference_forward(x, pos_embed, projection):
    """Plain-JAX reference for correctness check (projection tail of the module)."""
    B, L, D = x.shape
    h = x + pos_embed[:, :L]
    p = jnp.einsum("bld,dp->blp", h, projection)
    p = p.reshape(B, L, IN_CHANNELS, PATCH_SIZE).transpose(0, 2, 1, 3)
    return p.reshape(B, IN_CHANNELS, L * PATCH_SIZE)[..., :AUDIO_LENGTH]


if __name__ == "__main__":
    key = jax.random.PRNGKey(0)
    k_x, k_proj, k_style = jax.random.split(key, 3)

    # deterministic parameter init (mirrors __init__ shapes)
    # projection: he_init((embed_dim, patch_size*in_channels), fan_in=embed_dim)
    projection = jax.random.normal(
        k_proj, (EMBED_DIM, PATCH_SIZE * IN_CHANNELS), jnp.float32
    ) * math.sqrt(2.0 / EMBED_DIM)
    position_embed = _sinusoidal_pos_embed(MAX_POS, EMBED_DIM)            # (1, MAX_POS, D)
    style_embeddings = jax.random.normal(
        k_style, (NUM_STYLES, EMBED_DIM), jnp.float32
    ) * 0.02  # parameter parity; consumed by the external Transformer, unused here

    # one-time weight preprocessing (load-time, not per-forward)
    w_blockdiag = jax.block_until_ready(make_blockdiag_projection(projection, SEQ_LEN))

    # example latent input
    x = jax.random.normal(k_x, (BATCH, SEQ_LEN, EMBED_DIM), jnp.float32)
    style_id = jnp.zeros((BATCH,), jnp.int32)

    fwd = jax.jit(audio_decoder_forward)
    out = fwd(x, position_embed, w_blockdiag, style_id)
    out = jax.block_until_ready(out)

    ref = _reference_forward(x, position_embed, projection)
    assert out.shape == (BATCH, IN_CHANNELS, AUDIO_LENGTH), out.shape
    assert jnp.allclose(out, ref, atol=1e-4, rtol=1e-4), "mismatch vs reference"

    print("KERNEL_OK")
</pallas_src>

<mosaic_0001>
module attributes {stable_mosaic.version = 11 : i64} {
  func.func @audio_decoder_kernel(%arg0: memref<2x256xf32, #tpu.memory_space<vmem>>, %arg1: memref<1x256xf32, #tpu.memory_space<vmem>>, %arg2: memref<256x128xf32, #tpu.memory_space<vmem>>, %arg3: memref<2x128xf32, #tpu.memory_space<vmem>>) attributes {dimension_semantics = [], scalar_prefetch = 0 : i64, scratch_operands = 0 : i64, tpu.core_type = #tpu.core_type<tc>} {
    %c0 = arith.constant 0 : index
    %c0_0 = arith.constant 0 : index
    %0 = vector.load %arg0[%c0, %c0_0] : memref<2x256xf32, #tpu.memory_space<vmem>>, vector<2x256xf32>
    %c0_1 = arith.constant 0 : index
    %c0_2 = arith.constant 0 : index
    %1 = vector.load %arg1[%c0_1, %c0_2] : memref<1x256xf32, #tpu.memory_space<vmem>>, vector<1x256xf32>
    %2 = vector.broadcast %1 : vector<1x256xf32> to vector<2x256xf32>
    %3 = arith.addf %0, %2 : vector<2x256xf32>
    %c0_3 = arith.constant 0 : index
    %c0_4 = arith.constant 0 : index
    %4 = vector.load %arg2[%c0_3, %c0_4] : memref<256x128xf32, #tpu.memory_space<vmem>>, vector<256x128xf32>
    %cst = arith.constant dense<0.000000e+00> : vector<2x128xf32>
    %5 = tpu.matmul %3, %4, %cst {dimension_numbers = #tpu.dot_dimension_numbers<[1], [0], [0], [1], [0, 0, 1, 1], [], []>} : vector<2x256xf32>, vector<256x128xf32>, vector<2x128xf32> -> vector<2x128xf32>
    %c0_5 = arith.constant 0 : index
    %c0_6 = arith.constant 0 : index
    %6 = vector.load %arg3[%c0_5, %c0_6] : memref<2x128xf32, #tpu.memory_space<vmem>>, vector<2x128xf32>
    tpu.vector_store %arg3[%c0_5, %c0_6], %5 {strides = array<i32>} : memref<2x128xf32, #tpu.memory_space<vmem>>, vector<2x128xf32>,
    return
  }
}

</mosaic_0001>

<bundles_post_ra>
// kernel: squeeze.1
= control target key start
LH: loop header
LB: loop body
LE: loop exit
PB: predicated region body
PF: predicated region fallthrough
CT: control target
= control target key end

     0   :  { %s7_s6 = smov 3  ;;  %s14_s9 = smov 3  ;;  %vm4_vm0 = vcmask 261120   ;;  %vm11_vm1 = vcmask 1048320   ;;  %vm18_vm2 = vcmask 785920   ;;  %vm25_vm3 = vcmask 523520   ;;  %s76_s0 = inlined_call_operand.vmem [shape: f32[1,8,32], index: 0, kind: input, shape index: {}]   ;;  %s77_s1 = inlined_call_operand.vmem [shape: f32[1,256], index: 1, kind: output, shape index: {}]  }
   0x1   :  { %v38_v0 = vld [vmem:[%s76_s0 + $0x3] ss:$4 sm:%s7_s6]   ;;  %s45_s10 = smov 96   ;;  %s21_s11 = smov 3  ;;  %v39_v1 = vld [vmem:[%s76_s0 + $0x2] ss:$4 sm:%s14_s9]  }
   0x2   :  { %9 = vrot.lane.b32.xlu0 %v38_v0, %s45_s10  ;;  %v40_v2 = vld [vmem:[%s76_s0 + $0x1] ss:$4 sm:%s21_s11]   ;;  %s2_s16 = smov 3  ;;  %s46_s17 = smov 32  }
   0x3   :  { %23 = vrot.lane.b32.xlu1 %v40_v2, %s46_s17  ;;  %v3_v3 = vld [vmem:[%s76_s0] ss:$4 sm:%s2_s16]   ;;  %s47_s0 = smov 64  }
   0x4   :  { %5 = vst.msk [vmem:[#allocation0] ss:$8 sm:$0x3] %vm4_vm0, %v3_v3  }
   0x6   :  { %16 = vrot.lane.b32.xlu0 %v39_v1, %s47_s0 }
  0x74   :  { %v10_v4 = vpop.permute.xlu0 %9  }
  0x75   :  { %12 = vst.msk [vmem:[#allocation0] ss:$8 sm:$0x3] %vm11_vm1, %v10_v4   ;;  %v24_v5 = vpop.permute.xlu1 %23  }
  0x78   :  { %v17_v6 = vpop.permute.xlu0 %16  }
  0x79   :  { %19 = vst.msk [vmem:[#allocation0] ss:$8 sm:$0x3] %vm18_vm2, %v17_v6  }
  0x7a   :  { %26 = vst.msk [vmem:[#allocation0] ss:$8 sm:$0x3] %vm25_vm3, %v24_v5  }
  0x81   :  { %v30_v7 = vld [vmem:[#allocation0] sm:$0x1]  ;;  %v34_v8 = vld [vmem:[#allocation0 + $0x8] sm:$0x1] }
  0x82   :  { %32 = vst [vmem:[%s77_s1] sm:$0x1] %v30_v7  ;;  %41 = vst [vmem:[%s77_s1 + $0x1] sm:$0x1] %v34_v8 }

// kernel: audio_decoder_forward.1
= control target key start
LH: loop header
LB: loop body
LE: loop exit
PB: predicated region body
PF: predicated region fallthrough
CT: control target
= control target key end

     0   :  { %8 = vsyncpa [#allocation3], 0  ;;  %s354_s0 = inlined_call_operand.vmem [shape: f32[2,256], index: 0, kind: input, shape index: {}]   ;;  %s355_s1 = inlined_call_operand.vmem [shape: f32[1,256], index: 1, kind: input, shape index: {}]   ;;  %s356_s2 = inlined_call_operand.hbm [shape: f32[256,128], index: 2, kind: input, shape index: {}]   ;;  %s357_s3 = inlined_call_operand.hbm [shape: f32[2,128], index: 3, kind: output, shape index: {}]  }
   0x1   :  { %9 = vsyncpa [#allocation4], 0  ;;  %s299_s12 = smov [#allocation2]   ;;  %s251_s16 = scalar_lea.hbm %s356_s2, 4096 }
   0x2   :  { %s19_s13 = sshll.u32 %s299_s12, 4  ;;  %p252_p0 = scmp.ne.s32.totalorder %s356_s2, %s251_s16  ;;  %s20_s13 = int_to_ptr.vmem [resolvable:$true] %s19_s13 }
   0x3   :  { %p255_p1 = scmp.lt.u32.totalorder %s251_s16, %s356_s2 }
   0x5   :  { %p257_p2 = pnand %p255_p1, %p252_p0 }
   0x7   :  { %260 = shalt.err (!%p257_p2)
}
   0x8   :  { %s261_s21 = scalar_lea.vmem %s20_s13, 4096  ;;  %p266_p4 = scmp.lt.s32.totalorder %s20_s13, %s20_s13 }
   0x9   :  { %p262_p3 = scmp.ne.s32.totalorder %s20_s13, %s261_s21  ;;  %p267_p5 = scmp.lt.s32.totalorder %s261_s21, %s261_s21 }
   0xb   :  { %p268_p6 = por %p267_p5, %p266_p4 }
   0xd   :  { %p269_p7 = pnand %p268_p6, %p262_p3 }
   0xf   :  { %272 = shalt.err (!%p269_p7)
}
  0x10   :  { %s300_s22 = smov 128   ;;  %s301_s23 = smov 8  }
  0x11   :  { %25 = dma.hbm_to_vmem [thread:$0]  %s356_s2, 4096, %s20_s13, [#allocation3], %s300_s22, %s300_s22, %s301_s23  }
  0x12   :  { %295 = dma.done.wait [#allocation3], 4096  }
  0x13   :  { %296 = vsyncadd [#allocation3], 4294963200  ;;  %v66_v0 = vld [vmem:[#allocation2 + $0x80] sm:$0xff]  ;;  %v67_v1 = vld [vmem:[#allocation2 + $0x88] sm:$0xff]  ;;  %v32_v3 = vlaneseq  ;;  %v302_v16 = vmov 1983009808  }
  0x14   :  { %v50_v2 = vld [vmem:[#allocation2] sm:$0xff]  ;;  %v214_v4 = vpack.c.bf16 %v67_v1, %v66_v0  ;;  %v51_v5 = vld [vmem:[#allocation2 + $0x8] sm:$0xff]  ;;  %v68_v6 = vld [vmem:[#allocation2 + $0x90] sm:$0xff]  ;;  %v42_v17 = vunpack.c.l.s4 %v302_v16 }
  0x15   :  { %v69_v7 = vld [vmem:[#allocation2 + $0x98] sm:$0xff]  ;;  %v216_v8 = vpack.c.bf16 %v51_v5, %v50_v2  ;;  %v52_v10 = vld [vmem:[#allocation2 + $0x10] sm:$0xff]  ;;  %v70_v12 = vld [vmem:[#allocation2 + $0xa0] sm:$0xff]  ;;  %v33_v15 = vshrl.u32 %v32_v3, 7 }
  0x16   :  { %v218_v9 = vpack.c.bf16 %v69_v7, %v68_v6  ;;  %v53_v11 = vld [vmem:[#allocation2 + $0x18] sm:$0xff]  ;;  %215 = vmatprep.subr.bf16.mxu0 %v214_v4  ;;  %v71_v13 = vld [vmem:[#allocation2 + $0xa8] sm:$0xff]  ;;  %v54_v19 = vld [vmem:[#allocation2 + $0x20] sm:$0xff]  ;;  %v43_v26 = vunpack.c.0.s8 %v42_v17 }
  0x17   :  { %217 = vmatpush3.bf16.msra.mxu0 %v216_v8  ;;  %v220_v14 = vpack.c.bf16 %v53_v11, %v52_v10  ;;  %v222_v18 = vpack.c.bf16 %v71_v13, %v70_v12  ;;  %v55_v20 = vld [vmem:[#allocation2 + $0x28] sm:$0xff]  ;;  %v72_v21 = vld [vmem:[#allocation2 + $0xb0] sm:$0xff]  ;;  %v73_v22 = vld [vmem:[#allocation2 + $0xb8] sm:$0xff]  ;;  %v34_v24 = vsub.s32 0, %v33_v15  ;;  %v38_v25 = vsub.s32 1, %v33_v15 }
  0x18   :  { %219 = vmatprep.subr.bf16.mxu0 %v218_v9  ;;  %v224_v23 = vpack.c.bf16 %v55_v20, %v54_v19  ;;  %v226_v27 = vpack.c.bf16 %v73_v22, %v72_v21  ;;  %v56_v28 = vld [vmem:[#allocation2 + $0x30] sm:$0xff]  ;;  %v57_v29 = vld [vmem:[#allocation2 + $0x38] sm:$0xff]  ;;  %v74_v30 = vld [vmem:[#allocation2 + $0xc0] sm:$0xff]  ;;  %v46_v36 = vsub.s32 %v43_v26, %v33_v15 }
  0x19   :  { %v75_v31 = vld [vmem:[#allocation2 + $0xc8] sm:$0xff]  ;;  %v30_v32 = vld [vmem:[%s355_s1] sm:$0x3]  ;;  %v228_v33 = vpack.c.bf16 %v57_v29, %v56_v28  ;;  %v76_v40 = vld [vmem:[#allocation2 + $0xd0] sm:$0xff] }
  0x1a   :  { %v35_v34 = vrot.slane %v30_v32, %v34_v24  ;;  %v39_v35 = vrot.slane %v30_v32, %v38_v25  ;;  %v230_v37 = vpack.c.bf16 %v75_v31, %v74_v30  ;;  %v58_v38 = vld [vmem:[#allocation2 + $0x40] sm:$0xff]  ;;  %v59_v39 = vld [vmem:[#allocation2 + $0x48] sm:$0xff]  ;;  %v77_v41 = vld [vmem:[#allocation2 + $0xd8] sm:$0xff] }
  0x1b   :  { %221 = vmatpush3.bf16.msra.mxu0 %v220_v14  ;;  %v29_v43 = vld [vmem:[%s354_s0] sm:$0xf]  ;;  %v232_v44 = vpack.c.bf16 %v59_v39, %v58_v38  ;;  %v234_v46 = vpack.c.bf16 %v77_v41, %v76_v40  ;;  %v60_v47 = vld [vmem:[#allocation2 + $0x50] sm:$0xff]  ;;  %v61_v48 = vld [vmem:[#allocation2 + $0x58] sm:$0xff]  ;;  %s303_s0 = smov [#allocation5]  }
  0x1c   :  { %223 = vmatprep.subr.bf16.mxu0 %v222_v18  ;;  %v40_v42 = vcombine.low %v35_v34, %v39_v35  ;;  %v78_v49 = vld [vmem:[#allocation2 + $0xe0] sm:$0xff]  ;;  %v79_v50 = vld [vmem:[#allocation2 + $0xe8] sm:$0xff]  ;;  %v236_v52 = vpack.c.bf16 %v61_v48, %v60_v47  ;;  %v80_v57 = vld [vmem:[#allocation2 + $0xf0] sm:$0xff]  ;;  %s170_s1 = sshll.u32 %s303_s0, 4  ;;  %s171_s1 = int_to_ptr.vmem [resolvable:$true] %s170_s1 }
  0x1d   :  { %v238_v54 = vpack.c.bf16 %v79_v50, %v78_v49  ;;  %v62_v55 = vld [vmem:[#allocation2 + $0x60] sm:$0xff]  ;;  %v63_v56 = vld [vmem:[#allocation2 + $0x68] sm:$0xff]  ;;  %v81_v58 = vld [vmem:[#allocation2 + $0xf8] sm:$0xff]  ;;  %s273_s29 = scalar_lea.vmem %s171_s1, 32  ;;  %p278_p9 = scmp.lt.s32.totalorder %s171_s1, %s171_s1 }
  0x1e   :  { %v47_v45 = vrot.slane %v40_v42, %v46_v36  ;;  %v240_v60 = vpack.c.bf16 %v63_v56, %v62_v55  ;;  %v242_v61 = vpack.c.bf16 %v81_v58, %v80_v57  ;;  %v64_v62 = vld [vmem:[#allocation2 + $0x70] sm:$0xff]  ;;  %v65_v63 = vld [vmem:[#allocation2 + $0x78] sm:$0xff]  ;;  %p274_p8 = scmp.ne.s32.totalorder %s171_s1, %s273_s29  ;;  %p279_p10 = scmp.lt.s32.totalorder %s273_s29, %s273_s29 }
  0x1f   :  { %225 = vmatpush3.bf16.msra.mxu0 %v224_v23  ;;  %v244_v0 = vpack.c.bf16 %v65_v63, %v64_v62 }
  0x20   :  { %227 = vmatprep.subr.bf16.mxu0 %v226_v27  ;;  %v49_v51 = vadd.f32 %v47_v45, %v29_v43  ;;  %p280_p11 = por %p279_p10, %p278_p9 }
  0x22   :  { %v89_v53 = vrot.slane %v49_v51, %v46_v36  ;;  %p281_p12 = pnand %p280_p11, %p274_p8 }
  0x23   :  { %229 = vmatpush3.bf16.msra.mxu0 %v228_v33 }
  0x24   :  { %231 = vmatprep.subr.bf16.mxu0 %v230_v37  ;;  %v90_v59 = vcombine.high %v89_v53, %v89_v53 }
  0x26   :  { %157 = vmatprep.mubr.f32.mxu0 %v90_v59 }
  0x27   :  { %233 = vmatpush3.bf16.msra.mxu0 %v232_v44 }
  0x28   :  { %235 = vmatprep.subr.bf16.mxu0 %v234_v46 }
  0x2b   :  { %237 = vmatpush3.bf16.msra.mxu0 %v236_v52 }
  0x2c   :  { %239 = vmatprep.subr.bf16.mxu0 %v238_v54 }
  0x2f   :  { %241 = vmatpush3.bf16.msra.mxu0 %v240_v60 }
  0x30   :  { %243 = vmatprep.subr.bf16.mxu0 %v242_v61 }
  0x33   :  { %245 = vmatpush3.bf16.msra.mxu0 %v244_v0 }
  0x36   :  { %158 = vmatmul.mubr.f32.vlgmr.msra.gmra.mrb[0].mxu0 %v89_v53 }
 0x109   :  { %v211_v1 = vpop.f32.mrb[0].mxu0 }
 0x10a   :  { %v212_v2 = vpop.f32.mrb[1].mxu0 }
 0x10b   :  { %v213_v3 = vadd.f32 %v212_v2, %v211_v1 }
 0x10d   :  { %163 = vst [vmem:[#allocation5] sm:$0x3] %v213_v3 }
 0x10e   :  { %284 = shalt.err (!%p281_p12)
}
 0x10f   :  { %s285_s5 = scalar_lea.hbm %s357_s3, 32 }
 0x110   :  { %p286_p13 = scmp.ne.s32.totalorder %s357_s3, %s285_s5  ;;  %p289_p0 = scmp.lt.u32.totalorder %s285_s5, %s357_s3 }
 0x112   :  { %p291_p1 = pnand %p289_p0, %p286_p13 }
 0x114   :  { %294 = shalt.err (!%p291_p1)
}
 0x115   :  { %173 = dma.vmem_to_hbm [thread:$0]  %s171_s1, 32, %s357_s3, [#allocation4]  }
 0x116   :  { %297 = dma.done.wait [#allocation4], 32  }
 0x117   :  { %298 = vsyncadd [#allocation4], 4294967264 }
 0x118   :  { %177 = vsyncpa [#allocation3], 1 }
 0x119   :  { %178 = vsyncpa [#allocation4], 1 }

</bundles_post_ra>
